<compile_context>
chip_gen: v6e
topology: v6e:2x2x1
jax: 0.10.0
libtpu: 0.0.40
codegen_flags: <defaults>
</compile_context>

<pallas_src>
import jax
import jax.numpy as jnp
from jax.experimental import pallas as pl
from jax.experimental.pallas import tpu as pltpu


def _homo_aggregate_kernel(wpt_ref, feat_ref, neigh_ref,
                           wf_ref, wn_ref, g_ref, ex_ref, h_ref,
                           out_ref):
    f32 = jnp.float32
    feat = feat_ref[...].astype(f32)      # (TN, C)
    neigh = neigh_ref[...].astype(f32)    # (TN, S*C)  lane-dense stream
    wpt = wpt_ref[...].astype(f32)        # (TN, S*F)  weight_p tiled over S

    wf = wf_ref[...]                      # (C,   S*F) block-diag selector (self half)
    wn = wn_ref[...]                      # (S*C, S*F) block-diag selector (neigh half)
    g = g_ref[...]                        # (S*F, S)   0/1: sum over facets per neighbour
    ex = ex_ref[...]                      # (S,   S*C) 0/1: broadcast att over C lanes
    h = h_ref[...]                        # (S*C, C)   0/1: sum over neighbours per channel

    # Facet selector dots on the MXU:
    #   dot[r, s*F+f] = <feat[r] facet f, wc1> + <neigh[r, s] facet f, wc2>
    dot = (jnp.dot(feat, wf, preferred_element_type=f32)
           + jnp.dot(neigh, wn, preferred_element_type=f32))      # (TN, S*F)
    p = jnp.maximum(dot, 0.0)                                     # relu

    # weight_p facet mix + F-group reduction (MXU, 0/1 matrix).
    score = jnp.dot(p * wpt, g, preferred_element_type=f32)       # (TN, S)

    # Softmax over the neighbour axis (torch dim=2); tiny (TN, S) tensor.
    score = score - jnp.max(score, axis=-1, keepdims=True)
    e = jnp.exp(score)
    att = e * pl.reciprocal(jnp.sum(e, axis=-1, keepdims=True), approx=False)

    # TODO(synk): training-mode dropout on `att` is not implemented (the module
    # is run with eval semantics, where fn.dropout is the identity).

    # Broadcast att over each C-lane segment via the MXU (no sublane<->lane
    # relayout), then one dense VPU multiply on the streamed tensor.
    att_x = jnp.dot(att, ex, preferred_element_type=f32)          # (TN, S*C)
    weighted = att_x * neigh                                      # (TN, S*C)

    # Sum over the S neighbours (MXU, 0/1 matrix) + relu, then store.
    out = jnp.dot(weighted, h, preferred_element_type=f32)        # (TN, C)
    out_ref[...] = jnp.maximum(out, 0.0).astype(out_ref.dtype)


def _choose_row_tile(n_rows, in_itemsize, s, c):
    """Row tile TN (multiple of 8): the double-buffered input stream plus ~3
    f32 (TN, S*C) in-kernel temporaries must fit a per-generation scoped-VMEM
    budget; TN is also capped so the row grid has at least two steps."""
    try:
        vmem_phys = pltpu.get_tpu_info().vmem_capacity_bytes
    except Exception:
        vmem_phys = 64 * 1024 * 1024                     # conservative (v7x)
    vmem_limit = min(64 * 1024 * 1024, max(32 * 1024 * 1024, vmem_phys // 2))
    # f32 working set per row: ~3 (S*C) f32 temporaries + 2x double-buffered
    # input stream + small (C / S*F) operands and the output block.
    per_row = s * c * (3 * 4 + 2 * in_itemsize) + 12 * c * 4
    budget = vmem_limit // 2                             # headroom for pipeline bufs
    tn = max(8, (budget // max(per_row, 1)) // 8 * 8)
    rows_pad8 = -(-n_rows // 8) * 8
    half = max(8, (rows_pad8 // 2) // 8 * 8)             # >= 2 grid steps (v7x megacore)
    return min(tn, half), vmem_limit


def homo_aggregate_attention(weight_p, feature, neigh_feature, weight_cat,
                             n_facet):
    B, N, S, C = neigh_feature.shape
    F = n_facet
    E = C // F
    assert C == F * E
    assert feature.shape == (B, N, C)
    assert weight_p.shape == (B, N, F)
    assert weight_cat.shape == (2 * E,)

    # Flatten batch into the row axis; lane-dense (R, S*C) neighbour stream.
    R = B * N
    feat = feature.reshape(R, C)
    neigh2d = neigh_feature.reshape(R, S * C)
    # weight_p tiled across S in the wrapper: wpt[r, s*F + f] = weight_p[r, f].
    wpt = jnp.tile(weight_p.reshape(R, F).astype(jnp.float32), (1, S))

    # Constant selector / reduction matrices (built once, DMA'd once).
    f32 = jnp.float32
    wc1 = weight_cat[:E].astype(f32)
    wc2 = weight_cat[E:].astype(f32)
    eye_f = jnp.eye(F, dtype=f32)
    eye_s = jnp.eye(S, dtype=f32)
    sel_f = jnp.kron(eye_f, wc1.reshape(E, 1))               # (C, F)
    sel_n = jnp.kron(eye_f, wc2.reshape(E, 1))               # (C, F)
    w_f = jnp.tile(sel_f, (1, S))                            # (C, S*F)
    w_n = jnp.kron(eye_s, sel_n)                             # (S*C, S*F)
    g_mat = jnp.kron(eye_s, jnp.ones((F, 1), f32))           # (S*F, S)
    expand = jnp.kron(eye_s, jnp.ones((1, C), f32))          # (S, S*C)
    h_mat = jnp.tile(jnp.eye(C, dtype=f32), (S, 1))          # (S*C, C)

    in_itemsize = jnp.dtype(neigh2d.dtype).itemsize
    TN, vmem_limit = _choose_row_tile(R, in_itemsize, S, C)
    R_pad = -(-R // TN) * TN
    if R_pad != R:
        d = R_pad - R
        wpt = jnp.pad(wpt, ((0, d), (0, 0)))
        feat = jnp.pad(feat, ((0, d), (0, 0)))
        neigh2d = jnp.pad(neigh2d, ((0, d), (0, 0)))
        # Padded rows: zero scores -> uniform softmax -> zero output; sliced off.

    # TODO(synk): the (TN, C=32) output store is lane-masked; repacking the
    # output into a (R_pad*C/128, 128) slab would make it lane-dense, but the
    # writeback is only ~1/8 of HBM bytes so it is left simple here.
    # TODO(synk): once HBM-bound, pipeline_mode=pl.Buffered(3) on the neigh
    # in_spec can hide DMA turnaround on v5e/v6e (recheck the VMEM budget).
    out = pl.pallas_call(
        _homo_aggregate_kernel,
        out_shape=jax.ShapeDtypeStruct((R_pad, C), feature.dtype),
        grid_spec=pltpu.PrefetchScalarGridSpec(
            num_scalar_prefetch=0,
            grid=(R_pad // TN,),
            in_specs=[
                pl.BlockSpec((TN, S * F), lambda i: (i, 0)),   # wpt
                pl.BlockSpec((TN, C), lambda i: (i, 0)),       # feat
                pl.BlockSpec((TN, S * C), lambda i: (i, 0)),   # neigh (lane-dense)
                pl.BlockSpec((C, S * F), lambda i: (0, 0)),    # w_f
                pl.BlockSpec((S * C, S * F), lambda i: (0, 0)),  # w_n
                pl.BlockSpec((S * F, S), lambda i: (0, 0)),    # g
                pl.BlockSpec((S, S * C), lambda i: (0, 0)),    # expand
                pl.BlockSpec((S * C, C), lambda i: (0, 0)),    # h
            ],
            out_specs=pl.BlockSpec((TN, C), lambda i: (i, 0)),
        ),
        compiler_params=pltpu.CompilerParams(
            dimension_semantics=("parallel",),
            vmem_limit_bytes=vmem_limit,
        ),
    )(wpt, feat, neigh2d, w_f, w_n, g_mat, expand, h_mat)

    return out[:R].reshape(B, N, C)


def reference(weight_p, feature, neigh_feature, weight_cat, n_facet):
    """Pure-JAX transcription of the PyTorch forward (eval mode)."""
    B, N, S, C = neigh_feature.shape
    F = n_facet
    E = C // F
    f = feature.reshape(B, N, 1, F, E)
    f = jnp.broadcast_to(f, (B, N, S, F, E))
    nf = neigh_feature.reshape(B, N, S, F, E)
    cat = jnp.concatenate([f, nf], axis=4)                        # (B,N,S,F,2E)
    p = jax.nn.relu(jnp.sum(cat * weight_cat.reshape(1, 1, 1, 1, 2 * E), axis=4))
    p = jnp.sum(p * weight_p.reshape(B, N, 1, F), axis=3)
    p = jax.nn.softmax(p, axis=2)
    out = jax.nn.relu(jnp.sum(neigh_feature * p[..., None], axis=2))
    return out


if __name__ == "__main__":
    # Small shapes consistent with the module.
    B, N, S = 2, 8, 8          # batch, n_with_neg, neigh_size
    n_facet = 4
    cur_dim = 32               # emb_dim = 8
    emb_dim = cur_dim // n_facet

    key = jax.random.PRNGKey(0)
    k_wc, k_wp, k_f, k_nf = jax.random.split(key, 4)

    weight_cat = jax.random.normal(k_wc, (2 * emb_dim,), dtype=jnp.float32)
    weight_p = jax.random.normal(k_wp, (B, N, n_facet), dtype=jnp.float32)
    feature = jax.random.normal(k_f, (B, N, cur_dim), dtype=jnp.float32)
    neigh_feature = jax.random.normal(k_nf, (B, N, S, cur_dim), dtype=jnp.float32)

    out = homo_aggregate_attention(weight_p, feature, neigh_feature,
                                   weight_cat, n_facet)
    out = jax.block_until_ready(out)

    ref = reference(weight_p, feature, neigh_feature, weight_cat, n_facet)
    assert out.shape == (B, N, cur_dim)
    assert jnp.allclose(out, ref, atol=2e-5, rtol=2e-5), "mismatch vs reference"

    print("KERNEL_OK")
</pallas_src>

<mosaic_0001>
module attributes {stable_mosaic.version = 11 : i64} {
  func.func @_homo_aggregate_kernel(%arg0: i32, %arg1: memref<8x32xf32, #tpu.memory_space<vmem>>, %arg2: memref<8x32xf32, #tpu.memory_space<vmem>>, %arg3: memref<8x256xf32, #tpu.memory_space<vmem>>, %arg4: memref<32x32xf32, #tpu.memory_space<vmem>>, %arg5: memref<256x32xf32, #tpu.memory_space<vmem>>, %arg6: memref<32x8xf32, #tpu.memory_space<vmem>>, %arg7: memref<8x256xf32, #tpu.memory_space<vmem>>, %arg8: memref<256x32xf32, #tpu.memory_space<vmem>>, %arg9: memref<8x32xf32, #tpu.memory_space<vmem>>) attributes {dimension_semantics = [#tpu.dimension_semantics<parallel>], iteration_bounds = array<i64: 2>, scalar_prefetch = 0 : i64, scratch_operands = 0 : i64, tpu.core_type = #tpu.core_type<tc>, window_params = [{transform_indices = @transform_0, window_bounds = array<i64: 8, 32>}, {transform_indices = @transform_1, window_bounds = array<i64: 8, 32>}, {transform_indices = @transform_2, window_bounds = array<i64: 8, 256>}, {pipeline_mode = #tpu.pipeline_mode<synchronous>, transform_indices = @transform_3, window_bounds = array<i64: 32, 32>}, {pipeline_mode = #tpu.pipeline_mode<synchronous>, transform_indices = @transform_4, window_bounds = array<i64: 256, 32>}, {pipeline_mode = #tpu.pipeline_mode<synchronous>, transform_indices = @transform_5, window_bounds = array<i64: 32, 8>}, {pipeline_mode = #tpu.pipeline_mode<synchronous>, transform_indices = @transform_6, window_bounds = array<i64: 8, 256>}, {pipeline_mode = #tpu.pipeline_mode<synchronous>, transform_indices = @transform_7, window_bounds = array<i64: 256, 32>}, {transform_indices = @transform_8, window_bounds = array<i64: 8, 32>}]} {
    %c0 = arith.constant 0 : index
    %c0_0 = arith.constant 0 : index
    %0 = vector.load %arg2[%c0, %c0_0] : memref<8x32xf32, #tpu.memory_space<vmem>>, vector<8x32xf32>
    %c0_1 = arith.constant 0 : index
    %c0_2 = arith.constant 0 : index
    %1 = vector.load %arg3[%c0_1, %c0_2] : memref<8x256xf32, #tpu.memory_space<vmem>>, vector<8x256xf32>
    %c0_3 = arith.constant 0 : index
    %c0_4 = arith.constant 0 : index
    %2 = vector.load %arg1[%c0_3, %c0_4] : memref<8x32xf32, #tpu.memory_space<vmem>>, vector<8x32xf32>
    %c0_5 = arith.constant 0 : index
    %c0_6 = arith.constant 0 : index
    %3 = vector.load %arg4[%c0_5, %c0_6] : memref<32x32xf32, #tpu.memory_space<vmem>>, vector<32x32xf32>
    %c0_7 = arith.constant 0 : index
    %c0_8 = arith.constant 0 : index
    %4 = vector.load %arg5[%c0_7, %c0_8] : memref<256x32xf32, #tpu.memory_space<vmem>>, vector<256x32xf32>
    %c0_9 = arith.constant 0 : index
    %c0_10 = arith.constant 0 : index
    %5 = vector.load %arg6[%c0_9, %c0_10] : memref<32x8xf32, #tpu.memory_space<vmem>>, vector<32x8xf32>
    %c0_11 = arith.constant 0 : index
    %c0_12 = arith.constant 0 : index
    %6 = vector.load %arg7[%c0_11, %c0_12] : memref<8x256xf32, #tpu.memory_space<vmem>>, vector<8x256xf32>
    %c0_13 = arith.constant 0 : index
    %c0_14 = arith.constant 0 : index
    %7 = vector.load %arg8[%c0_13, %c0_14] : memref<256x32xf32, #tpu.memory_space<vmem>>, vector<256x32xf32>
    %cst = arith.constant dense<0.000000e+00> : vector<8x32xf32>
    %8 = tpu.matmul %0, %3, %cst {dimension_numbers = #tpu.dot_dimension_numbers<[1], [0], [0], [1], [0, 0, 1, 1], [], []>} : vector<8x32xf32>, vector<32x32xf32>, vector<8x32xf32> -> vector<8x32xf32>
    %cst_15 = arith.constant dense<0.000000e+00> : vector<8x32xf32>
    %9 = tpu.matmul %1, %4, %cst_15 {dimension_numbers = #tpu.dot_dimension_numbers<[1], [0], [0], [1], [0, 0, 1, 1], [], []>} : vector<8x256xf32>, vector<256x32xf32>, vector<8x32xf32> -> vector<8x32xf32>
    %10 = arith.addf %8, %9 : vector<8x32xf32>
    %cst_16 = arith.constant 0.000000e+00 : f32
    %11 = vector.broadcast %cst_16 : f32 to vector<8x32xf32>
    %12 = arith.maximumf %10, %11 : vector<8x32xf32>
    %13 = arith.mulf %12, %2 : vector<8x32xf32>
    %cst_17 = arith.constant dense<0.000000e+00> : vector<8x8xf32>
    %14 = tpu.matmul %13, %5, %cst_17 {dimension_numbers = #tpu.dot_dimension_numbers<[1], [0], [0], [1], [0, 0, 1, 1], [], []>} : vector<8x32xf32>, vector<32x8xf32>, vector<8x8xf32> -> vector<8x8xf32>
    %cst_18 = arith.constant dense<0xFF800000> : vector<8xf32>
    %15 = vector.multi_reduction <maximumf>, %14, %cst_18 [1] : vector<8x8xf32> to vector<8xf32>
    %16 = vector.shape_cast %15 : vector<8xf32> to vector<8x1xf32>
    %17 = vector.broadcast %16 : vector<8x1xf32> to vector<8x8xf32>
    %18 = arith.subf %14, %17 : vector<8x8xf32>
    %19 = math.exp %18 : vector<8x8xf32>
    %cst_19 = arith.constant dense<0.000000e+00> : vector<8xf32>
    %20 = vector.multi_reduction <add>, %19, %cst_19 [1] : vector<8x8xf32> to vector<8xf32>
    %21 = vector.shape_cast %20 : vector<8xf32> to vector<8x1xf32>
    %22 = tpu.reciprocal %21 : vector<8x1xf32> -> vector<8x1xf32>
    %23 = vector.broadcast %22 : vector<8x1xf32> to vector<8x8xf32>
    %24 = arith.mulf %19, %23 : vector<8x8xf32>
    %cst_20 = arith.constant dense<0.000000e+00> : vector<8x256xf32>
    %25 = tpu.matmul %24, %6, %cst_20 {dimension_numbers = #tpu.dot_dimension_numbers<[1], [0], [0], [1], [0, 0, 1, 1], [], []>} : vector<8x8xf32>, vector<8x256xf32>, vector<8x256xf32> -> vector<8x256xf32>
    %26 = arith.mulf %25, %1 : vector<8x256xf32>
    %cst_21 = arith.constant dense<0.000000e+00> : vector<8x32xf32>
    %27 = tpu.matmul %26, %7, %cst_21 {dimension_numbers = #tpu.dot_dimension_numbers<[1], [0], [0], [1], [0, 0, 1, 1], [], []>} : vector<8x256xf32>, vector<256x32xf32>, vector<8x32xf32> -> vector<8x32xf32>
    %cst_22 = arith.constant 0.000000e+00 : f32
    %28 = vector.broadcast %cst_22 : f32 to vector<8x32xf32>
    %29 = arith.maximumf %27, %28 : vector<8x32xf32>
    %c0_23 = arith.constant 0 : index
    %c0_24 = arith.constant 0 : index
    %30 = vector.load %arg9[%c0_23, %c0_24] : memref<8x32xf32, #tpu.memory_space<vmem>>, vector<8x32xf32>
    tpu.vector_store %arg9[%c0_23, %c0_24], %29 {strides = array<i32>} : memref<8x32xf32, #tpu.memory_space<vmem>>, vector<8x32xf32>,
    return
  }
  func.func @transform_0(%arg0: i32) -> (i32, i32) {
    %c0_i32 = arith.constant 0 : i32
    %c0_i32_0 = arith.constant 0 : i32
    return %arg0, %c0_i32 : i32, i32
  }
  func.func @transform_1(%arg0: i32) -> (i32, i32) {
    %c0_i32 = arith.constant 0 : i32
    %c0_i32_0 = arith.constant 0 : i32
    return %arg0, %c0_i32 : i32, i32
  }
  func.func @transform_2(%arg0: i32) -> (i32, i32) {
    %c0_i32 = arith.constant 0 : i32
    %c0_i32_0 = arith.constant 0 : i32
    return %arg0, %c0_i32 : i32, i32
  }
  func.func @transform_3(%arg0: i32) -> (i32, i32) {
    %c0_i32 = arith.constant 0 : i32
    %c0_i32_0 = arith.constant 0 : i32
    %c0_i32_1 = arith.constant 0 : i32
    return %c0_i32, %c0_i32_0 : i32, i32
  }
  func.func @transform_4(%arg0: i32) -> (i32, i32) {
    %c0_i32 = arith.constant 0 : i32
    %c0_i32_0 = arith.constant 0 : i32
    %c0_i32_1 = arith.constant 0 : i32
    return %c0_i32, %c0_i32_0 : i32, i32
  }
  func.func @transform_5(%arg0: i32) -> (i32, i32) {
    %c0_i32 = arith.constant 0 : i32
    %c0_i32_0 = arith.constant 0 : i32
    %c0_i32_1 = arith.constant 0 : i32
    return %c0_i32, %c0_i32_0 : i32, i32
  }
  func.func @transform_6(%arg0: i32) -> (i32, i32) {
    %c0_i32 = arith.constant 0 : i32
    %c0_i32_0 = arith.constant 0 : i32
    %c0_i32_1 = arith.constant 0 : i32
    return %c0_i32, %c0_i32_0 : i32, i32
  }
  func.func @transform_7(%arg0: i32) -> (i32, i32) {
    %c0_i32 = arith.constant 0 : i32
    %c0_i32_0 = arith.constant 0 : i32
    %c0_i32_1 = arith.constant 0 : i32
    return %c0_i32, %c0_i32_0 : i32, i32
  }
  func.func @transform_8(%arg0: i32) -> (i32, i32) {
    %c0_i32 = arith.constant 0 : i32
    %c0_i32_0 = arith.constant 0 : i32
    return %arg0, %c0_i32 : i32, i32
  }
}

</mosaic_0001>

<bundles_post_ra>
// kernel: tpu_custom_call.1
= control target key start
LH: loop header
LB: loop body
LE: loop exit
PB: predicated region body
PF: predicated region fallthrough
CT: control target
= control target key end

     0   :  { %13 = vsyncpa [#allocation3], 0  ;;  %s1520_s0 = inlined_call_operand.vmem [shape: f32[16,32], index: 0, kind: input, shape index: {}]   ;;  %s1521_s1 = inlined_call_operand.vmem [shape: f32[16,32], index: 1, kind: input, shape index: {}]   ;;  %s1522_s2 = inlined_call_operand.vmem [shape: f32[16,256], index: 2, kind: input, shape index: {}]   ;;  %s1523_s3 = inlined_call_operand.vmem [shape: f32[32,32], index: 3, kind: input, shape index: {}]   ;;  %s1524_s4 = inlined_call_operand.vmem [shape: f32[256,32], index: 4, kind: input, shape index: {}]   ;;  %s1525_s5 = inlined_call_operand.vmem [shape: f32[32,8], index: 5, kind: input, shape index: {}]   ;;  %s1526_s6 = inlined_call_operand.vmem [shape: f32[8,256], index: 6, kind: input, shape index: {}]   ;;  %s1527_s7 = inlined_call_operand.vmem [shape: f32[256,32], index: 7, kind: input, shape index: {}]   ;;  %s1528_s8 = inlined_call_operand.hbm [shape: f32[16,32], index: 8, kind: output, shape index: {}]  }
   0x1   :  { %15 = vsyncpa [#allocation3 + $0x1], 0  ;;  %s1166_s27 = smov 0   ;;  %s1168_s28 = smov 0  }
   0x2   :  { %s1170_s29 = smov 0   ;;  %s1172_s30 = smov 0  }
   0x3 LB: > { %s1187_s9 = sadd.s32 4294967295, %s1116_s30   ;;  %s892_s10 = sadd.s32 4294967294, %s1116_s30   ;;  %s1116_s30 = sphi %s1172_s30, %s1534_s30   ;;  %s1112_s29 = sphi %s1170_s29, %s1533_s29   ;;  %s1108_s28 = sphi %s1168_s28, %s1532_s28   ;;  %s1104_s27 = sphi %s1166_s27, %s1531_s27  }
   0x4   : > { %s1191_s11 = sadd.s32 1, %s1116_s30   ;;  %s211_s12 = sadd.s32 1, %s1112_s29 }
   0x5   : > { %s208_s13 = ssub.s32 %s1116_s30, %s1191_s11  ;;  %p221_p0 = scmp.ne.s32.totalorder %s1112_s29, %s1108_s28 }
   0x6   : > { %p209_p1 = scmp.eq.s32.totalorder %s208_s13, 0  ;;  %p222_p2 = scmp.eq.s32.totalorder %s1187_s9, 1 }
   0x7   : > { %p227_p3 = scmp.ne.s32.totalorder %s1108_s28, %s1104_s27  ;;  %p228_p4 = scmp.eq.s32.totalorder %s892_s10, 1 }
   0x8   : > { %s1202_s14 = scalar_select %p209_p1, %s1112_s29, %s211_s12  }
   0x9   : > { %p1204_p5 = por %p222_p2, %p221_p0  ;;  %p1208_p6 = por %p228_p4, %p227_p3 }
   0xa   : > { %p895_p7 = scmp.ge.s32.totalorder %s1116_s30, 1  ;;  %p283_p8 = scmp.lt.s32.totalorder %s1116_s30, 3 }
   0xc   : > { %p284_p9 = pnand %p895_p7, %p283_p8 }
   0xd   : > { %p325_p10 = scmp.lt.s32.totalorder (!%p284_p9), %s1187_s9, 1  ;;  %s322_s18 = sand.u32 (!%p284_p9), 1, %s1108_s28  }
   0xe   : > { %287 = sbr.rel (%p284_p9) target bundleno = 1174 (0x496), region = 52  ;;  %s896_s21 = sshll.u32 (!%p284_p9), %s322_s18, 3 }
   0xf   : > { %s905_s22 = sshll.u32 (!%p284_p9), %s1187_s9, 7  ;;  %s796_s26 = scalar_lea.sflag (!%p284_p9), [#allocation3], %s322_s18 }
  0x13   : > { %v377_v0 = vld [vmem:[%s1524_s4 + $0xf8] sm:$0xff]  ;;  %v376_v2 = vld [vmem:[%s1524_s4 + $0xf0] sm:$0xff]  ;;  %v1118_v4 = vmov 0.0   ;;  %v375_v5 = vld [vmem:[%s1524_s4 + $0xe8] sm:$0xff]  ;;  %s1232_s10 = scalar_select %p325_p10, %s1187_s9, 1  ;;  %vm1119_vm0 = vmmov 0  }
  0x14   : > { %v361_v1 = vld [vmem:[%s1524_s4 + $0x78] sm:$0xff]  ;;  %909 = vmatprep.subr.mxu0 %v377_v0  ;;  %v360_v3 = vld [vmem:[%s1524_s4 + $0x70] sm:$0xff]  ;;  %1000 = vmatprep.subr.mxu1 %v1118_v4  ;;  %v359_v6 = vld [vmem:[%s1524_s4 + $0x68] sm:$0xff]  ;;  %vm486_vm1 = vcmask 261120   ;;  %vm635_vm2 = vcmask 64512  }
  0x15   : > { %910 = vmatpush3.msra.mxu0 %v361_v1  ;;  %1008 = vmatprep.mubr.msk.f32.mxu1 %vm1119_vm0, %v1118_v4  ;;  %v374_v7 = vld [vmem:[%s1524_s4 + $0xe0] sm:$0xff]  ;;  %s908_s19 = sshll.u32 %s1232_s10, 4  ;;  %v373_v9 = vld [vmem:[%s1524_s4 + $0xd8] sm:$0xff]  ;;  %v372_v11 = vld [vmem:[%s1524_s4 + $0xd0] sm:$0xff]  ;;  %s897_s20 = sshll.u32 %s1232_s10, 3 }
  0x16   : > { %911 = vmatprep.subr.mxu0 %v376_v2  ;;  %v358_v8 = vld [vmem:[%s1524_s4 + $0x60] sm:$0xff]  ;;  %v357_v10 = vld [vmem:[%s1524_s4 + $0x58] sm:$0xff]  ;;  %s1255_s13 = scalar_lea.vmem %s1522_s2, %s908_s19  ;;  %v356_v12 = vld [vmem:[%s1524_s4 + $0x50] sm:$0xff]  ;;  %s332_s25 = scalar_lea.vmem %s1521_s1, %s897_s20 }
  0x17   : > { %912 = vmatpush3.msra.mxu0 %v360_v3  ;;  %v371_v13 = vld [vmem:[%s1524_s4 + $0xc8] sm:$0xff]  ;;  %v370_v16 = vld [vmem:[%s1524_s4 + $0xc0] sm:$0xff]  ;;  %v369_v18 = vld [vmem:[%s1524_s4 + $0xb8] sm:$0xff]  ;;  %s328_s12 = scalar_lea.vmem %s1520_s0, %s897_s20  ;;  %s1120_s10 = smov [#allocation2]  }
  0x18   : > { %913 = vmatprep.subr.mxu0 %v375_v5  ;;  %v1267_v14 = vld [vmem:[%s1255_s13 + $0x8] sm:$0xff]  ;;  %v354_v17 = vld [vmem:[%s1524_s4 + $0x40] sm:$0xff]  ;;  %v353_v19 = vld [vmem:[%s1524_s4 + $0x38] sm:$0xff]  ;;  %s1060_s20 = sshll.u32 %s1120_s10, 4  ;;  %s1061_s20 = int_to_ptr.vmem [resolvable:$false] %s1060_s20 }
  0x19   : > { %914 = vmatpush3.msra.mxu0 %v359_v6  ;;  %v355_v15 = vld [vmem:[%s1524_s4 + $0x48] sm:$0xff]  ;;  %480 = vmatprep.mubr.f32.mxu0 %v1267_v14  ;;  %v368_v20 = vld [vmem:[%s1524_s4 + $0xb0] sm:$0xff]  ;;  %v366_v24 = vld [vmem:[%s1524_s4 + $0xa0] sm:$0xff]  ;;  %s1062_s9 = scalar_lea.vmem %s1061_s20, 256 }
  0x1a   : > { %915 = vmatprep.subr.mxu0 %v374_v7  ;;  %v352_v21 = vld [vmem:[%s1524_s4 + $0x30] sm:$0xff]  ;;  %v367_v22 = vld [vmem:[%s1524_s4 + $0xa8] sm:$0xff]  ;;  %v350_v25 = vld [vmem:[%s1524_s4 + $0x20] sm:$0xff] }
  0x1b   : > { %916 = vmatpush3.msra.mxu0 %v358_v8  ;;  %v351_v23 = vld [vmem:[%s1524_s4 + $0x28] sm:$0xff]  ;;  %v365_v26 = vld [vmem:[%s1524_s4 + $0x98] sm:$0xff]  ;;  %v364_v28 = vld [vmem:[%s1524_s4 + $0x90] sm:$0xff] }
  0x1c   : > { %917 = vmatprep.subr.mxu0 %v373_v9  ;;  %v349_v27 = vld [vmem:[%s1524_s4 + $0x18] sm:$0xff]  ;;  %v348_v29 = vld [vmem:[%s1524_s4 + $0x10] sm:$0xff]  ;;  %v363_v30 = vld [vmem:[%s1524_s4 + $0x88] sm:$0xff] }
  0x1d   : > { %918 = vmatpush3.msra.mxu0 %v357_v10  ;;  %v347_v31 = vld [vmem:[%s1524_s4 + $0x8] sm:$0xff]  ;;  %v362_v32 = vld [vmem:[%s1524_s4 + $0x80] sm:$0xff]  ;;  %v345_v35 = vld [vmem:[%s1523_s3 + $0x18] sm:$0xff] }
  0x1e   : > { %919 = vmatprep.subr.mxu0 %v372_v11  ;;  %v346_v33 = vld [vmem:[%s1524_s4] sm:$0xff]  ;;  %v344_v36 = vld [vmem:[%s1523_s3 + $0x10] sm:$0xff]  ;;  %v343_v37 = vld [vmem:[%s1523_s3 + $0x8] sm:$0xff] }
  0x1f   : > { %920 = vmatpush3.msra.mxu0 %v356_v12  ;;  %v1328_v34 = vld [vmem:[%s1255_s13] sm:$0xff]  ;;  %v381_v40 = vld [vmem:[%s1525_s5 + $0x18] sm:$0xff]  ;;  %v380_v41 = vld [vmem:[%s1525_s5 + $0x10] sm:$0xff]  ;;  %s324_s13 = scalar_lea.vmem [#allocation2], %s896_s21 }
  0x20   : > { %921 = vmatprep.subr.mxu0 %v371_v13  ;;  %v342_v38 = vld [vmem:[%s1523_s3] sm:$0xff]  ;;  %1001 = vmatpush3.msra.mxu1 %v381_v40  ;;  %v379_v42 = vld [vmem:[%s1525_s5 + $0x8] sm:$0xff]  ;;  %v415_v63 = vld [vmem:[%s1527_s7 + $0xf8] sm:$0xff]  ;;  %s809_s23 = sshll.u32 %s324_s13, 4  ;;  %s810_s23 = int_to_ptr.vmem [resolvable:$true] %s809_s23 }
  0x21   : > { %922 = vmatpush3.msra.mxu0 %v355_v15  ;;  %v338_v39 = vld [vmem:[%s332_s25] sm:$0xff]  ;;  %1002 = vmatprep.subr.mxu1 %v1118_v4  ;;  %v383_v61 = vld [vmem:[%s1526_s6 + $0x8] sm:$0xff]  ;;  %v399_v3 = vld [vmem:[%s1527_s7 + $0x78] sm:$0xff]  ;;  %s807_s25 = scalar_lea.hbm %s1528_s8, %s905_s22  ;;  %p1063_p0 = scmp.lt.s32.totalorder %s810_s23, %s1061_s20 }
  0x22   : > { %923 = vmatprep.subr.mxu0 %v370_v16  ;;  %1003 = vmatpush3.msra.mxu1 %v380_v41  ;;  %v378_v43 = vld [vmem:[%s1525_s5] sm:$0xff]  ;;  %v398_v5 = vld [vmem:[%s1527_s7 + $0x70] sm:$0xff]  ;;  %v413_v6 = vld [vmem:[%s1527_s7 + $0xe8] sm:$0xff] }
  0x23   : > { %924 = vmatpush3.msra.mxu0 %v354_v17  ;;  %1004 = vmatprep.subr.mxu1 %v1118_v4  ;;  %v341_v49 = vld [vmem:[%s328_s12] sm:$0xff]  ;;  %v397_v7 = vld [vmem:[%s1527_s7 + $0x68] sm:$0xff]  ;;  %v411_v10 = vld [vmem:[%s1527_s7 + $0xd8] sm:$0xff]  ;;  %s1056_s12 = scalar_lea.vmem %s810_s23, 128 }
  0x24   : > { %925 = vmatprep.subr.mxu0 %v369_v18  ;;  %1005 = vmatpush3.msra.mxu1 %v379_v42  ;;  %v382_v62 = vld [vmem:[%s1526_s6] sm:$0xff]  ;;  %v395_v11 = vld [vmem:[%s1527_s7 + $0x58] sm:$0xff]  ;;  %v410_v12 = vld [vmem:[%s1527_s7 + $0xd0] sm:$0xff]  ;;  %p1057_p11 = scmp.ne.s32.totalorder %s810_s23, %s1056_s12  ;;  %p1064_p1 = scmp.lt.s32.totalorder %s1062_s9, %s1056_s12 }
  0x25   : > { %926 = vmatpush3.msra.mxu0 %v353_v19  ;;  %1006 = vmatprep.subr.mxu1 %v1118_v4  ;;  %v412_v8 = vld [vmem:[%s1527_s7 + $0xe0] sm:$0xff]  ;;  %v394_v13 = vld [vmem:[%s1527_s7 + $0x50] sm:$0xff]  ;;  %v409_v15 = vld [vmem:[%s1527_s7 + $0xc8] sm:$0xff] }
  0x26   : > { %927 = vmatprep.subr.mxu0 %v368_v20  ;;  %1007 = vmatpush3.msra.mxu1 %v378_v43  ;;  %v396_v9 = vld [vmem:[%s1527_s7 + $0x60] sm:$0xff]  ;;  %v393_v16 = vld [vmem:[%s1527_s7 + $0x48] sm:$0xff]  ;;  %v407_v19 = vld [vmem:[%s1527_s7 + $0xb8] sm:$0xff]  ;;  %p1058_p12 = pnand %p1057_p11, %p1204_p5  ;;  %p1065_p2 = por %p1064_p1, %p1063_p0 }
  0x27   : > { %928 = vmatpush3.msra.mxu0 %v352_v21  ;;  %680 = vmatprep.subr.mxu1 %v383_v61  ;;  %v408_v17 = vld [vmem:[%s1527_s7 + $0xc0] sm:$0xff]  ;;  %v391_v20 = vld [vmem:[%s1527_s7 + $0x38] sm:$0xff]  ;;  %v406_v21 = vld [vmem:[%s1527_s7 + $0xb0] sm:$0xff] }
  0x28   : > { %929 = vmatprep.subr.mxu0 %v367_v22  ;;  %v392_v18 = vld [vmem:[%s1527_s7 + $0x40] sm:$0xff]  ;;  %v390_v22 = vld [vmem:[%s1527_s7 + $0x30] sm:$0xff]  ;;  %p1059_p13 = pneg %p1058_p12 }
  0x29   : > { %930 = vmatpush3.msra.mxu0 %v351_v23  ;;  %v405_v23 = vld [vmem:[%s1527_s7 + $0xa8] sm:$0xff] }
  0x2a   : > { %931 = vmatprep.subr.mxu0 %v366_v24  ;;  %v389_v24 = vld [vmem:[%s1527_s7 + $0x28] sm:$0xff]  ;;  %p1066_p3 = pnand %p1065_p2, %p1059_p13 }
  0x2b   : > { %932 = vmatpush3.msra.mxu0 %v350_v25  ;;  %v404_v25 = vld [vmem:[%s1527_s7 + $0xa0] sm:$0xff] }
  0x2c   : > { %933 = vmatprep.subr.mxu0 %v365_v26  ;;  %v388_v26 = vld [vmem:[%s1527_s7 + $0x20] sm:$0xff] }
  0x2d   : > { %934 = vmatpush3.msra.mxu0 %v349_v27  ;;  %v403_v27 = vld [vmem:[%s1527_s7 + $0x98] sm:$0xff] }
  0x2e   : > { %935 = vmatprep.subr.mxu0 %v364_v28  ;;  %v387_v28 = vld [vmem:[%s1527_s7 + $0x18] sm:$0xff] }
  0x2f   : > { %936 = vmatpush3.msra.mxu0 %v348_v29  ;;  %v402_v29 = vld [vmem:[%s1527_s7 + $0x90] sm:$0xff] }
  0x30   : > { %937 = vmatprep.subr.mxu0 %v363_v30  ;;  %v386_v30 = vld [vmem:[%s1527_s7 + $0x10] sm:$0xff] }
  0x31   : > { %938 = vmatpush3.msra.mxu0 %v347_v31  ;;  %v401_v31 = vld [vmem:[%s1527_s7 + $0x88] sm:$0xff] }
  0x32   : > { %939 = vmatprep.subr.mxu0 %v362_v32  ;;  %v385_v32 = vld [vmem:[%s1527_s7 + $0x8] sm:$0xff] }
  0x33   : > { %940 = vmatpush3.msra.mxu0 %v346_v33  ;;  %v400_v33 = vld [vmem:[%s1527_s7 + $0x80] sm:$0xff] }
  0x34   : > { %481 = vmatmul.mubr.f32.vlgmr.msra.gmra.mxu0 %v1328_v34  ;;  %989 = vmatprep.subr.mxu0 %v1118_v4 }
  0x35   : > { %990 = vmatpush3.msra.mxu0 %v345_v35  ;;  %997 = vmatprep.mubr.msk.f32.mxu0 %vm1119_vm0, %v1118_v4  ;;  %v384_v35 = vld [vmem:[%s1527_s7] sm:$0xff] }
  0x36   : > { %991 = vmatprep.subr.mxu0 %v1118_v4 }
  0x37   : > { %992 = vmatpush3.msra.mxu0 %v344_v36 }
  0x38   : > { %993 = vmatprep.subr.mxu0 %v1118_v4 }
  0x39   : > { %994 = vmatpush3.msra.mxu0 %v343_v37 }
  0x3a   : > { %995 = vmatprep.subr.mxu0 %v1118_v4 }
  0x3b   : > { %996 = vmatpush3.msra.mxu0 %v342_v38 }
  0x3c   : > { %998 = vmatmul.mubr.msk.f32.vlgmr.msra.gmra.mxu0 %vm486_vm1, %v338_v39 }
  0xf4   : > { %v941_v44 = vpop.f32.mrf.mxu0 }
  0xf6   : > { %v942_v45 = vpop.f32.mrf.mxu0 }
  0xf7   : > { %v943_v46 = vadd.f32 %v942_v45, %v941_v44 }
  0xfc   : > { %v556_v47 = vpop.f32.mrf.mxu0 }
  0xfd   : > { %v557_v48 = vadd.f32 %v943_v46, %v556_v47 }
  0xfe   : > { %v999_v50 = vpop.f32.mrf.mxu0 }
  0xff   : > { %v560_v51 = vmax.f32 %v557_v48, 0.0 }
 0x101   : > { %v561_v52 = vmul.f32 %v560_v51, %v341_v49 }
 0x103   : > { %1009 = vmatmul.mubr.msk.f32.vlgmr.msra.gmra.mxu1 %vm486_vm1, %v561_v52 }
 0x104   : > { %714 = vmatprep.mubr.f32.mxu1 %v1118_v4  ;;  %681 = vmatpush1.msra.mxu1 %v382_v62  ;;  %v414_v4 = vld [vmem:[%s1527_s7 + $0xf0] sm:$0xff] }
 0x105   : > { %954 = vmatprep.subr.mxu1 %v415_v63 }
 0x1c3   : > { %v631_v53 = vpop.f32.mrf.mxu1 }
 0x1c4   : > { %v636_v54 = vsel %vm635_vm2, %v631_v53, -inf }
 0x1c5   : > { %637 = vmax.xlane.f32.xlu0 %v636_v54  ;;  %v1010_v55 = vpop.f32.mrf.mxu1 }
 0x24e   : > { %v638_v56 = vpop.xlane.xlu0 %637 }
 0x24f   : > { %v639_v57 = vsub.f32 %v631_v53, %v638_v56 }
 0x251   : > { %v640_v58 = vmul.f32 1.442695, %v639_v57 }
 0x253   : > { %1052 = vpow2.f32 %v640_v58 }
 0x260   : > { %v1053_v59 = vpop.eup %1052 }
 0x261   : > { %v642_v60 = vsel %vm635_vm2, %v1053_v59, 0.0 }
 0x262   : > { %643 = vadd.xlane.f32.xlu0 %v642_v60 }
 0x2eb   : > { %v644_v0 = vpop.xlane.xlu0 %643 }
 0x2ec   : > { %1054 = vrcp.f32 %v644_v0 }
 0x2f9   : > { %v1055_v1 = vpop.eup %1054 }
 0x2fa   : > { %v646_v2 = vmul.f32 %v1055_v1, %v1053_v59 }
 0x2fc   : > { %903 = vmatmul.mubr.msk.f32.vlgmr.msra.gmra.mxu1 %vm635_vm2, %v646_v2 }
 0x2fd   : > { %955 = vmatpush3.msra.mxu1 %v399_v3 }
 0x2fe   : > { %956 = vmatprep.subr.mxu1 %v414_v4 }
 0x2ff   : > { %957 = vmatpush3.msra.mxu1 %v398_v5 }
 0x300   : > { %958 = vmatprep.subr.mxu1 %v413_v6 }
 0x301   : > { %959 = vmatpush3.msra.mxu1 %v397_v7 }
 0x302   : > { %960 = vmatprep.subr.mxu1 %v412_v8 }
 0x303   : > { %961 = vmatpush3.msra.mxu1 %v396_v9 }
 0x304   : > { %962 = vmatprep.subr.mxu1 %v411_v10 }
 0x305   : > { %963 = vmatpush3.msra.mxu1 %v395_v11 }
 0x306   : > { %964 = vmatprep.subr.mxu1 %v410_v12 }
 0x307   : > { %965 = vmatpush3.msra.mxu1 %v394_v13 }
 0x308   : > { %966 = vmatprep.subr.mxu1 %v409_v15 }
 0x309   : > { %967 = vmatpush3.msra.mxu1 %v393_v16 }
 0x30a   : > { %968 = vmatprep.subr.mxu1 %v408_v17 }
 0x30b   : > { %969 = vmatpush3.msra.mxu1 %v392_v18 }
 0x30c   : > { %970 = vmatprep.subr.mxu1 %v407_v19 }
 0x30d   : > { %971 = vmatpush3.msra.mxu1 %v391_v20 }
 0x30e   : > { %972 = vmatprep.subr.mxu1 %v406_v21 }
 0x30f   : > { %973 = vmatpush3.msra.mxu1 %v390_v22 }
 0x310   : > { %974 = vmatprep.subr.mxu1 %v405_v23 }
 0x311   : > { %975 = vmatpush3.msra.mxu1 %v389_v24 }
 0x312   : > { %976 = vmatprep.subr.mxu1 %v404_v25 }
 0x313   : > { %977 = vmatpush3.msra.mxu1 %v388_v26 }
 0x314   : > { %978 = vmatprep.subr.mxu1 %v403_v27 }
 0x315   : > { %979 = vmatpush3.msra.mxu1 %v387_v28 }
 0x316   : > { %980 = vmatprep.subr.mxu1 %v402_v29 }
 0x317   : > { %981 = vmatpush3.msra.mxu1 %v386_v30 }
 0x318   : > { %982 = vmatprep.subr.mxu1 %v401_v31 }
 0x319   : > { %983 = vmatpush3.msra.mxu1 %v385_v32 }
 0x31a   : > { %984 = vmatprep.subr.mxu1 %v400_v33 }
 0x31b   : > { %985 = vmatpush3.msra.mxu1 %v384_v35 }
 0x3bc   : > { %v716_v36 = vpop.f32.mrf.mxu1 }
 0x3bd   : > { %v721_v39 = vmul.f32 %v716_v36, %v1328_v34 }
 0x3be   : > { %v718_v37 = vpop.f32.mrf.mxu1 }
 0x3bf   : > { %v722_v38 = vmul.f32 %v718_v37, %v1267_v14 }
 0x3c1   : > { %787 = vmatprep.mubr.f32.mxu1 %v722_v38 }
 0x3c2   : > { %788 = vmatmul.mubr.f32.vlgmr.msra.gmra.mxu1 %v721_v39 }
 0x482   : > { %v986_v40 = vpop.f32.mrf.mxu1 }
 0x484   : > { %v987_v41 = vpop.f32.mrf.mxu1 }
 0x485   : > { %v988_v42 = vadd.f32 %v987_v41, %v986_v40 }
 0x487   : > { %v793_v43 = vmax.f32 %v988_v42, 0.0 }
 0x489   : > { %794 = vst.msk [vmem:[%s324_s13] sm:$0xff] %vm486_vm1, %v793_v43 }
 0x48a   : > { %1069 = shalt.err (!%p1066_p3)
}
 0x48b   : > { %s1070_s17 = scalar_lea.hbm %s807_s25, 128  ;;  %s1074_s22 = scalar_lea.hbm %s1528_s8, 256 }
 0x48c   : > { %p1071_p4 = scmp.ne.s32.totalorder %s807_s25, %s1070_s17  ;;  %p1075_p9 = scmp.lt.s32.totalorder %s807_s25, %s1528_s8 }
 0x48d   : > { %p1076_p10 = scmp.lt.s32.totalorder %s1074_s22, %s1070_s17 }
 0x48e   : > { %p1072_p7 = pnand %p1071_p4, %p1204_p5 }
 0x48f   : > { %p1077_p11 = por %p1076_p10, %p1075_p9 }
 0x490   : > { %p1073_p8 = pneg %p1072_p7 }
 0x492   : > { %p1078_p12 = pnand %p1077_p11, %p1073_p8 }
 0x494   : > { %1081 = shalt.err (!%p1078_p12)
}
 0x495   : > { %1011 = dma.vmem_to_hbm [thread:$0]  (%p1204_p5), %s810_s23, 128, %s807_s25, %s796_s26  }
 0x496 PF: > { %p1017_p13 = scmp.ge.s32.totalorder %s1116_s30, 2  ;;  %s821_s24 = sand.u32 1, %s1104_s27  }
 0x497   : > { %s822_s12 = scalar_lea.sflag [#allocation3], %s821_s24 }
 0x498   : > { %p1014_p0 = pnand %p1017_p13, %p1208_p6 }
 0x49a   : > { %p1015_p1 = pneg %p1014_p0 }
 0x49c   : > { %1099 = dma.done.wait (%p1015_p1), %s822_s12, 128  }
 0x49d   : > { %1101 = vsyncadd (%p1015_p1), %s822_s12, 4294967168  ;;  %p18_p2 = scmp.ge.s32.totalorder %s1191_s11, 4   ;;  %s1531_s27 = smov %s1108_s28 }
 0x49e   : > { %s1532_s28 = smov %s1112_s29  ;;  %s1533_s29 = smov %s1202_s14 }
 0x49f   : > { %s1534_s30 = smov %s1191_s11  ;;  %20 = sbr.rel (!%p18_p2) target bundleno = 3 (0x3), region = 93 }
 0x4a4   :  { %827 = vsyncpa [#allocation3], 1 }
 0x4a5   :  { %829 = vsyncpa [#allocation3 + $0x1], 1 }

</bundles_post_ra>
